<compile_context>
chip_gen: v5e
topology: v5e:2x2
jax: 0.10.0
libtpu: 0.0.40
codegen_flags: <defaults>
</compile_context>

<pallas_src>
import functools

import numpy as np
import jax
import jax.numpy as jnp
from jax.experimental import pallas as pl
from jax.experimental.pallas import tpu as pltpu

_LANE = 128
_SUBLANE_BF16 = 16  # bf16 packs 16 sublanes per vreg


def _round_up(x, m):
    return ((x + m - 1) // m) * m


# --------------------------------------------------------------------------
# Kernels. tids_ref is the scalar-prefetched per-row-tile type-id table (SMEM).
# Streaming variants get the per-tile weight block via the index_map; resident
# variants see the full stacked weights and select in-kernel.
# --------------------------------------------------------------------------
def _kern_stream(tids_ref, x_ref, w_ref, b_ref, o_ref):
    acc = jnp.dot(x_ref[...], w_ref[...], preferred_element_type=jnp.float32)
    o_ref[...] = (acc + b_ref[...].astype(jnp.float32)).astype(o_ref.dtype)


def _kern_stream_extra(tids_ref, x_ref, w_ref, b_ref, e_ref, o_ref):
    acc = jnp.dot(x_ref[...], w_ref[...], preferred_element_type=jnp.float32)
    acc = acc + b_ref[...].astype(jnp.float32) + e_ref[...].astype(jnp.float32)
    o_ref[...] = acc.astype(o_ref.dtype)


def _kern_resident(tids_ref, x_ref, w_ref, b_ref, o_ref):
    t = tids_ref[pl.program_id(0)]
    acc = jnp.dot(x_ref[...], w_ref[t], preferred_element_type=jnp.float32)
    o_ref[...] = (acc + b_ref[t].astype(jnp.float32)).astype(o_ref.dtype)


def _kern_resident_extra(tids_ref, x_ref, w_ref, b_ref, e_ref, o_ref):
    t = tids_ref[pl.program_id(0)]
    acc = jnp.dot(x_ref[...], w_ref[t], preferred_element_type=jnp.float32)
    acc = acc + b_ref[t].astype(jnp.float32) + e_ref[...].astype(jnp.float32)
    o_ref[...] = acc.astype(o_ref.dtype)


# --------------------------------------------------------------------------
# One jitted forward: bf16-cast + pad + concat + grouped-GEMM + slice-back.
# All shape-dependent decisions (row padding, tile ids, residency, VMEM budget)
# are static at trace time. Row counts are bucketed to row_tile multiples,
# which bounds retracing for dynamic graphs.
# --------------------------------------------------------------------------
@functools.partial(
    jax.jit, static_argnames=("type_idx", "row_tile", "out_dim", "out_dtype"))
def _node_applied_forward(x_parts, e_parts, w_stack, b_stack, *,
                          type_idx, row_tile, out_dim, out_dtype):
    out_dtype = jnp.dtype(out_dtype)
    in_dim = x_parts[0].shape[1]
    T, _, out_pad = w_stack.shape
    rt = row_tile
    has_e = len(e_parts) > 0

    xb_parts, eb_parts, tile_ids, spans = [], [], [], []
    row = 0
    for i, x in enumerate(x_parts):
        n = x.shape[0]
        n_pad = _round_up(n, rt)
        # bf16 cast BEFORE pad/concat: x_cat is written once, already in bf16.
        xb_parts.append(jnp.pad(x.astype(jnp.bfloat16), ((0, n_pad - n), (0, 0))))
        if has_e:
            # TODO(synk): for out_dim << 128 this pad inflates the extras read;
            # feed extras already out_pad-wide upstream to avoid it.
            eb_parts.append(
                jnp.pad(e_parts[i], ((0, n_pad - n), (0, out_pad - out_dim))))
        tile_ids.extend([type_idx[i]] * (n_pad // rt))
        spans.append((row, n))
        row += n_pad

    x_cat = jnp.concatenate(xb_parts, axis=0)
    e_cat = jnp.concatenate(eb_parts, axis=0) if has_e else None
    tids = jnp.asarray(np.asarray(tile_ids, dtype=np.int32))
    total_rows = row
    num_tiles = total_rows // rt

    # Keep the whole weight stack resident in VMEM when it is small (constant
    # index_map -> fetched once); otherwise stream per-tile steered blocks.
    w_bytes = T * in_dim * out_pad * 2 + T * out_pad * 4
    resident = w_bytes <= (4 << 20)

    x_spec = pl.BlockSpec((rt, in_dim), lambda i, tids: (i, 0))
    out_spec = pl.BlockSpec((rt, out_pad), lambda i, tids: (i, 0))
    if resident:
        w_spec = pl.BlockSpec((T, in_dim, out_pad), lambda i, tids: (0, 0, 0))
        b_spec = pl.BlockSpec((T, 1, out_pad), lambda i, tids: (0, 0, 0))
        kernel = _kern_resident_extra if has_e else _kern_resident
    else:
        # TODO(synk): for very large in_dim/out_pad an additional N/K grid split
        # (f32 VMEM accumulator + pl.when init/finalize) would be needed to fit
        # v7x's 64 MiB VMEM; not required at DB-transformer dims.
        w_spec = pl.BlockSpec((None, in_dim, out_pad), lambda i, tids: (tids[i], 0, 0))
        b_spec = pl.BlockSpec((None, 1, out_pad), lambda i, tids: (tids[i], 0, 0))
        kernel = _kern_stream_extra if has_e else _kern_stream

    in_specs = [x_spec, w_spec, b_spec]
    operands = [x_cat, w_stack, b_stack]
    if has_e:
        in_specs.append(pl.BlockSpec((rt, out_pad), lambda i, tids: (i, 0)))
        operands.append(e_cat)

    # Explicit VMEM budget: double-buffered x/out/extra tiles + weights,
    # with headroom, capped at v7x's 64 MiB physical VMEM.
    e_itemsize = e_cat.dtype.itemsize if has_e else 0
    tile_bytes = 2 * rt * (in_dim * 2 + out_pad * (out_dtype.itemsize + e_itemsize))
    needed = tile_bytes + 2 * w_bytes
    vmem_limit = int(min(max(2 * needed, 32 << 20), 64 << 20))

    out_cat = pl.pallas_call(
        kernel,
        out_shape=jax.ShapeDtypeStruct((total_rows, out_pad), out_dtype),
        grid_spec=pltpu.PrefetchScalarGridSpec(
            num_scalar_prefetch=1,
            grid=(num_tiles,),
            in_specs=in_specs,
            out_specs=out_spec,
        ),
        compiler_params=pltpu.CompilerParams(
            # Row tiles are independent -> shard across the 2 TCs on v7x;
            # harmless on single-TC v5e/v6e.
            dimension_semantics=("parallel",),
            vmem_limit_bytes=vmem_limit,
        ),
    )(tids, *operands)

    return tuple(out_cat[off:off + n, :out_dim] for (off, n) in spans)


class NodeApplied:
    """JAX/Pallas port of NodeApplied with a per-node-type Linear factory.

    All node types are fused into ONE grouped-GEMM pallas_call per forward.
    dynamic_args extras (dicts indexed per key, non-dicts passed through) are
    fused into the kernel epilogue as additive terms.
    """

    def __init__(self, params_dict, node_types, dynamic_args=False,
                 row_tile_cap=512, out_dtype=None):
        # params_dict: {node_type: (W [in, out], b [1, out])} -- the "factory" output.
        assert row_tile_cap % _SUBLANE_BF16 == 0, "row_tile_cap must be a multiple of 16 (bf16 sublanes)"
        self.node_types = list(node_types)
        self.dynamic_args = dynamic_args
        self.row_tile_cap = int(row_tile_cap)
        self.out_dtype = out_dtype  # None -> match input dtype; set bf16 to halve store bytes
        self.type_index = {k: i for i, k in enumerate(self.node_types)}

        ws, bs = [], []
        in_dims, out_dims = set(), set()
        for k in self.node_types:
            w, b = params_dict[k]
            in_dims.add(w.shape[0])
            out_dims.add(w.shape[1])
            ws.append(jnp.asarray(w))
            bs.append(jnp.asarray(b).reshape(1, -1))
        assert len(in_dims) == 1 and len(out_dims) == 1, "fused path needs uniform dims"
        self.in_dim = in_dims.pop()
        self.out_dim = out_dims.pop()

        # Lane-dense output: pad the feature axis to a multiple of 128 so output
        # stores are full (unmasked) vst's. Params are cast/padded ONCE here
        # (bf16 weights for the MXU, f32 bias for the epilogue).
        self.out_pad = _round_up(self.out_dim, _LANE)
        pad = self.out_pad - self.out_dim
        self.w_stack = jnp.stack(
            [jnp.pad(w, ((0, 0), (0, pad))) for w in ws]).astype(jnp.bfloat16)
        self.b_stack = jnp.stack(
            [jnp.pad(b, ((0, 0), (0, pad))) for b in bs]).astype(jnp.float32)

    def _pick_row_tile(self, counts):
        max_rows = max(counts)
        rt = min(self.row_tile_cap, max(_SUBLANE_BF16, _round_up(max_rows, _SUBLANE_BF16)))
        # Ensure >= 2 row tiles when a single type carries all the rows so the
        # "parallel" grid axis can feed both v7x TensorCores.
        if len(counts) == 1 and max_rows > _SUBLANE_BF16:
            rt = min(rt, max(_SUBLANE_BF16, _round_up((max_rows + 1) // 2, _SUBLANE_BF16)))
        return rt

    def __call__(self, x_dict, *argv):
        if not x_dict:
            return {}

        keys = list(x_dict.keys())
        active = [k for k in keys if x_dict[k].shape[0] > 0]
        out_dtype = jnp.dtype(self.out_dtype) if self.out_dtype is not None else \
            jnp.dtype(x_dict[keys[0]].dtype)

        if not active:
            return {k: jnp.zeros((0, self.out_dim), out_dtype) for k in keys}

        extras = None
        if self.dynamic_args and argv:
            # TODO(synk): arbitrary factory callables consuming dynamic args have no
            # generic Pallas equivalent; extras are fused as additive epilogue terms.
            extras = {}
            for k in active:
                acc = None
                for arg in argv:
                    a = arg[k] if isinstance(arg, dict) else arg
                    assert a.shape == (x_dict[k].shape[0], self.out_dim), (k, a.shape)
                    acc = a if acc is None else acc + a
                extras[k] = acc

        rt = self._pick_row_tile([x_dict[k].shape[0] for k in active])
        x_parts = tuple(x_dict[k] for k in active)
        e_parts = tuple(extras[k] for k in active) if extras is not None else ()
        type_idx = tuple(self.type_index[k] for k in active)

        outs = _node_applied_forward(
            x_parts, e_parts, self.w_stack, self.b_stack,
            type_idx=type_idx, row_tile=rt, out_dim=self.out_dim,
            out_dtype=str(out_dtype))

        out_dict = {}
        it = iter(outs)
        active_set = set(active)
        for k in keys:
            if k in active_set:
                out_dict[k] = next(it)
            else:
                out_dict[k] = jnp.zeros((0, self.out_dim), out_dtype)
        return out_dict


if __name__ == "__main__":
    key = jax.random.PRNGKey(0)

    node_types = ["user", "item", "transaction", "review"]
    in_dim, out_dim = 32, 16
    num_rows = {"user": 8, "item": 16, "transaction": 8, "review": 0}

    # Deterministic per-node-type parameter init (synthetic "factory").
    params = {}
    x_dict = {}
    for k in node_types:
        key, kw, kb, kx = jax.random.split(key, 4)
        w = jax.random.normal(kw, (in_dim, out_dim), jnp.float32) * 0.1
        b = jax.random.normal(kb, (1, out_dim), jnp.float32) * 0.1
        params[k] = (w, b)
        x_dict[k] = jax.random.normal(kx, (num_rows[k], in_dim), jnp.float32)

    # Reference matches the kernel's numerics: bf16 inputs, f32 accumulation.
    def ref_linear(x, w, b):
        xr = x.astype(jnp.bfloat16).astype(jnp.float32)
        wr = w.astype(jnp.bfloat16).astype(jnp.float32)
        return xr @ wr + b

    # --- dynamic_args=False path (single fused pallas_call for all types) ---
    layer = NodeApplied(params, node_types, dynamic_args=False)
    out_dict = layer(x_dict)
    for k in node_types:
        out = jax.block_until_ready(out_dict[k])
        w, b = params[k]
        ref = ref_linear(x_dict[k], w, b)
        assert out.shape == (num_rows[k], out_dim), (k, out.shape)
        if num_rows[k] > 0:
            assert jnp.allclose(out, ref, atol=1e-4, rtol=1e-4), k

    # --- dynamic_args=True path (extras fused into the kernel epilogue) ---
    key, ke = jax.random.split(key)
    extra = {
        k: jax.random.normal(jax.random.fold_in(ke, i),
                             (num_rows[k], out_dim), jnp.float32)
        for i, k in enumerate(node_types)
    }
    layer_dyn = NodeApplied(params, node_types, dynamic_args=True)
    out_dyn = layer_dyn(x_dict, extra)
    for k in node_types:
        out = jax.block_until_ready(out_dyn[k])
        w, b = params[k]
        ref = ref_linear(x_dict[k], w, b) + extra[k]
        assert out.shape == (num_rows[k], out_dim), (k, out.shape)
        if num_rows[k] > 0:
            assert jnp.allclose(out, ref, atol=1e-4, rtol=1e-4), k

    print("KERNEL_OK")
</pallas_src>

<mosaic_0001>
module attributes {stable_mosaic.version = 11 : i64} {
  func.func @_kern_resident(%arg0: i32, %arg1: memref<3xi32, #tpu.memory_space<smem>>, %arg2: memref<16x32xbf16, #tpu.memory_space<vmem>>, %arg3: memref<4x32x128xbf16, #tpu.memory_space<vmem>>, %arg4: memref<4x1x128xf32, #tpu.memory_space<vmem>>, %arg5: memref<16x128xf32, #tpu.memory_space<vmem>>) attributes {dimension_semantics = [#tpu.dimension_semantics<parallel>], iteration_bounds = array<i64: 3>, scalar_prefetch = 1 : i64, scratch_operands = 0 : i64, tpu.core_type = #tpu.core_type<tc>, window_params = [{transform_indices = @transform_0, window_bounds = array<i64: 16, 32>}, {pipeline_mode = #tpu.pipeline_mode<synchronous>, transform_indices = @transform_1, window_bounds = array<i64: 4, 32, 128>}, {pipeline_mode = #tpu.pipeline_mode<synchronous>, transform_indices = @transform_2, window_bounds = array<i64: 4, 1, 128>}, {transform_indices = @transform_3, window_bounds = array<i64: 16, 128>}]} {
    %0 = arith.index_cast %arg0 : i32 to index
    %1 = memref.load %arg1[%0] : memref<3xi32, #tpu.memory_space<smem>>
    %c0 = arith.constant 0 : index
    %c0_0 = arith.constant 0 : index
    %2 = vector.load %arg2[%c0, %c0_0] : memref<16x32xbf16, #tpu.memory_space<vmem>>, vector<16x32xbf16>
    %3 = arith.index_cast %1 : i32 to index
    %c0_1 = arith.constant 0 : index
    %c0_2 = arith.constant 0 : index
    %4 = vector.load %arg3[%3, %c0_1, %c0_2] : memref<4x32x128xbf16, #tpu.memory_space<vmem>>, vector<1x32x128xbf16>
    %5 = vector.shape_cast %4 : vector<1x32x128xbf16> to vector<32x128xbf16>
    %cst = arith.constant dense<0.000000e+00> : vector<16x128xf32>
    %6 = tpu.matmul %2, %5, %cst {dimension_numbers = #tpu.dot_dimension_numbers<[1], [0], [0], [1], [0, 0, 1, 1], [], []>} : vector<16x32xbf16>, vector<32x128xbf16>, vector<16x128xf32> -> vector<16x128xf32>
    %7 = arith.index_cast %1 : i32 to index
    %c0_3 = arith.constant 0 : index
    %c0_4 = arith.constant 0 : index
    %8 = vector.load %arg4[%7, %c0_3, %c0_4] : memref<4x1x128xf32, #tpu.memory_space<vmem>>, vector<1x1x128xf32>
    %9 = vector.shape_cast %8 : vector<1x1x128xf32> to vector<1x128xf32>
    %10 = vector.broadcast %9 : vector<1x128xf32> to vector<16x128xf32>
    %11 = arith.addf %6, %10 : vector<16x128xf32>
    %c0_5 = arith.constant 0 : index
    %c0_6 = arith.constant 0 : index
    %12 = vector.load %arg5[%c0_5, %c0_6] : memref<16x128xf32, #tpu.memory_space<vmem>>, vector<16x128xf32>
    tpu.vector_store %arg5[%c0_5, %c0_6], %11 {strides = array<i32>} : memref<16x128xf32, #tpu.memory_space<vmem>>, vector<16x128xf32>,
    return
  }
  func.func @transform_0(%arg0: i32, %arg1: memref<3xi32, #tpu.memory_space<smem>>) -> (i32, i32) {
    %c0_i32 = arith.constant 0 : i32
    %c0_i32_0 = arith.constant 0 : i32
    return %arg0, %c0_i32 : i32, i32
  }
  func.func @transform_1(%arg0: i32, %arg1: memref<3xi32, #tpu.memory_space<smem>>) -> (i32, i32, i32) {
    %c0_i32 = arith.constant 0 : i32
    %c0_i32_0 = arith.constant 0 : i32
    %c0_i32_1 = arith.constant 0 : i32
    %c0_i32_2 = arith.constant 0 : i32
    return %c0_i32, %c0_i32_0, %c0_i32_1 : i32, i32, i32
  }
  func.func @transform_2(%arg0: i32, %arg1: memref<3xi32, #tpu.memory_space<smem>>) -> (i32, i32, i32) {
    %c0_i32 = arith.constant 0 : i32
    %c0_i32_0 = arith.constant 0 : i32
    %c0_i32_1 = arith.constant 0 : i32
    %c0_i32_2 = arith.constant 0 : i32
    return %c0_i32, %c0_i32_0, %c0_i32_1 : i32, i32, i32
  }
  func.func @transform_3(%arg0: i32, %arg1: memref<3xi32, #tpu.memory_space<smem>>) -> (i32, i32) {
    %c0_i32 = arith.constant 0 : i32
    %c0_i32_0 = arith.constant 0 : i32
    return %arg0, %c0_i32 : i32, i32
  }
}

</mosaic_0001>

<bundles_post_ra>
// kernel: _node_applied_forward.1
= control target key start
LH: loop header
LB: loop body
LE: loop exit
PB: predicated region body
PF: predicated region fallthrough
CT: control target
= control target key end

     0   :  { %s435_s18 = smov [#allocation3]   ;;  %s490_s0 = inlined_call_operand.vmem [shape: s32[3], index: 0, kind: input, shape index: {}]   ;;  %s491_s1 = inlined_call_operand.vmem [shape: bf16[48,32], index: 1, kind: input, shape index: {}]   ;;  %s492_s2 = inlined_call_operand.hbm [shape: bf16[4,32,128], index: 2, kind: input, shape index: {}]   ;;  %s493_s3 = inlined_call_operand.vmem [shape: f32[4,1,128], index: 3, kind: input, shape index: {}]   ;;  %s494_s4 = inlined_call_operand.vmem [shape: f32[48,128], index: 4, kind: output, shape index: {}]  }
   0x1   :  { %s10_s17 = sshll.u32 %s490_s0, 4  ;;  %s11_s17 = int_to_ptr.vmem [resolvable:$true] %s10_s17 }
   0x2   :  { %13 = dma.vmem_to_smem %s11_s17, 16, %s435_s18, [#allocation2] }
   0x3   :  { %425 = dma.done.wait [#allocation2], 16 }
   0x4   :  { %426 = vsyncadd [#allocation2], 4294967280 }
   0x5   :  { %16 = sfence }
   0x6   :  { %17 = vsyncpa [#allocation5], 0  ;;  %s467_s19 = smov 0  }
   0x7 LB: > { %s133_s0 = sshll.u32 %s492_s2, 4  ;;  %s324_s22 = sadd.s32 4294967295, %s433_s19   ;;  %s433_s19 = sphi %s467_s19, %s23_s19   ;;  %s134_s0 = int_to_ptr.hbm [resolvable:$true] %s133_s0 }
   0x8   : > { %p326_p0 = scmp.ge.s32.totalorder %s433_s19, 1  ;;  %p122_p1 = scmp.lt.s32.totalorder %s433_s19, 4 }
   0x9   : > { %p364_p2 = scmp.eq.s32.totalorder %s324_s22, 0  ;;  %s436_s23 = smov [#allocation4]  }
   0xa   : > { %p123_p3 = pnand %p326_p0, %p122_p1  ;;  %s135_s24 = sshll.u32 %s436_s23, 4  ;;  %s136_s24 = int_to_ptr.vmem [resolvable:$true] %s135_s24 }
   0xb   : > { %s437_s25 = smov 64   ;;  %s438_s26 = smov 4  }
   0xc   : > { %p360_p4 = pneg %p123_p3  ;;  %163 = sbr.rel (%p123_p3) target bundleno = 171 (0xab), region = 32 }
   0xe   : > { %p361_p5 = pnand %p364_p2, %p360_p4 }
  0x10   : > { %363 = dma.hbm_to_vmem [thread:$0]  (!%p361_p5), %s134_s0, 1024, %s136_s24, [#allocation5], %s437_s25, %s437_s25, %s438_s26  }
  0x11   : > { %428 = dma.done.wait (%p364_p2), [#allocation5], 1024  }
  0x12   : > { %430 = vsyncadd (%p364_p2), [#allocation5], 4294966272  ;;  %s331_s27 = sshll.u32 %s324_s22, 1  ;;  %s201_s28 = sld [smem:[#allocation3 + %s324_s22]]  ;;  %vm233_vm0 = vcmask 261120  }
  0x13   : > { %p189_p6 = scmp.lt.s32.totalorder %s331_s27, 5 }
  0x15   : > { %s496_s27 = smov (!%p189_p6, %s331_s27), 5 }
  0x16   : > { %s332_s7 = sshll.u32 %s496_s27, 2  ;;  %s334_s12 = sshll.u32 %s496_s27, 3 }
  0x17   : > { %s192_s11 = scalar_lea.vmem %s491_s1, %s332_s7  ;;  %s198_s15 = scalar_lea.vmem %s494_s4, %s334_s12 }
  0x18   : > { %s353_s29 = sshll.u32 %s201_s28, 4  ;;  %s211_s6 = scalar_lea.vmem %s493_s3, %s201_s28  ;;  %v352_v2 = vld [vmem:[%s192_s11] sm:$0xff] }
  0x19   : > { %s206_s8 = scalar_lea.vmem [#allocation4], %s353_s29  ;;  %v378_v3 = vld [vmem:[%s211_s6] ss:$0 sm:$0xff] }
  0x1a   : > { %v355_v0 = vld [vmem:[%s206_s8 + $0x8] sm:$0xff]  ;;  %v354_v1 = vld [vmem:[%s206_s8] sm:$0xff] }
  0x1b   : > { %243 = vmatpush.bf16.msra.mxu0 %v355_v0 }
  0x1f   : > { %244 = vmatpush.bf16.msra.mxu0 %v354_v1 }
  0x22   : > { %349 = vmatmul.msk.bf16.vlgmr.msra.gmra.mxu0 %vm233_vm0, %v352_v2 }
  0x9f   : > { %v246_v4 = vpop.f32.mrf.mxu0 }
  0xa0   : > { %v247_v5 = vadd.f32 %v378_v3, %v246_v4 }
  0xa2   : > { %251 = vst [vmem:[%s198_s15] sm:$0xff] %v247_v5 }
  0xa7   : > { %v248_v6 = vpop.f32.mrf.mxu0 }
  0xa8   : > { %v249_v7 = vadd.f32 %v378_v3, %v248_v6 }
  0xaa   : > { %252 = vst [vmem:[%s198_s15 + $0x8] sm:$0xff] %v249_v7 }
  0xab PF: > { %s23_s19 = sadd.s32 1, %s433_s19  }
  0xac   : > { %p20_p7 = scmp.ge.s32.totalorder %s23_s19, 5  }
  0xae   :  { %22 = sbr.rel (!%p20_p7) target bundleno = 7 (0x7), region = 69 }
  0xb3   :  { %275 = vsyncpa [#allocation5], 1 }
  0xb4   :  { %277 = vsyncpa [#allocation5 + $0x1], 1 }

</bundles_post_ra>
